<compile_context>
chip_gen: v5e
topology: v5e:2x2
jax: 0.10.0
libtpu: 0.0.40
codegen_flags: <defaults>
</compile_context>

<pallas_src>
import jax
import jax.numpy as jnp
from jax.experimental import pallas as pl
from jax.experimental.pallas import tpu as pltpu


def _cdiv(a, b):
    return -(-a // b)


def _round_up(x, m):
    return _cdiv(x, m) * m


def _block_diag(w, p):
    """(fin, fout) -> (p*fin, p*fout) block-diagonal replication of w."""
    fin, fout = w.shape
    eye = jnp.eye(p, dtype=w.dtype)
    # [i, a, j, b] = eye[i, j] * w[a, b]  ->  reshape to (p*fin, p*fout)
    return (eye[:, None, :, None] * w[None, :, None, :]).reshape(p * fin, p * fout)


def _deep_svdd_kernel(x_ref, w0_ref, w1_ref, o_ref):
    # First Linear (no bias) + ReLU, f32 accumulation on the MXU.
    h = jnp.dot(x_ref[...], w0_ref[...], preferred_element_type=jnp.float32)
    h = jnp.maximum(h, 0.0)
    # net_output Linear (no bias) + ReLU.
    out = jnp.dot(h, w1_ref[...], preferred_element_type=jnp.float32)
    out = jnp.maximum(out, 0.0)
    o_ref[...] = out.astype(o_ref.dtype)


def deep_svdd_forward(x, w0, w1, *, block_batch=8192):
    """x: (B, n_features); w0: (n_features, H0); w1: (H0, H1) -> (B, H1)."""
    B, F = x.shape
    H0 = w0.shape[1]
    H1 = w1.shape[1]

    # Row-packing factor: pack P original rows into one lane-dense row so the
    # packed feature width is >= 128 lanes (P=8 for the default F=16).
    P = max(1, _cdiv(128, F))
    unit = 8 * P                      # original-row multiple: 8 packed sublanes

    # --- tile / grid selection -------------------------------------------
    target = max(_round_up(min(block_batch, max(B, 1)), unit), unit)
    num_tiles = max(1, _cdiv(B, target))
    # v7x has two TensorCores: make sure both get a grid step for mid-size
    # batches (no-op cost on single-TC v5e/v6e).
    if B >= 4096 and num_tiles < 2:
        num_tiles = 2
    TB = max(_round_up(_cdiv(B, num_tiles), unit), unit)   # rows per tile
    Bp = num_tiles * TB

    # Padding is bounded by num_tiles*unit-1 rows (tiny), not a full tile, so
    # the pad/trim copies stay negligible vs. the streamed data.
    if Bp != B:
        x = jnp.pad(x, ((0, Bp - B), (0, 0)))

    # --- lane-dense packing (free reshapes, one-time weight blocking) -----
    rows = Bp // P                    # packed rows
    tb_rows = TB // P                 # packed rows per tile (multiple of 8)
    lx, lh0, lh1 = P * F, P * H0, P * H1
    xp = x.reshape(rows, lx)          # row-major contiguous -> free
    w0b = _block_diag(w0, P)          # (P*F,  P*H0)
    w1b = _block_diag(w1, P)          # (P*H0, P*H1)

    out = pl.pallas_call(
        _deep_svdd_kernel,
        out_shape=jax.ShapeDtypeStruct((rows, lh1), x.dtype),
        grid_spec=pl.GridSpec(
            grid=(num_tiles,),
            in_specs=[
                # x: tiled over packed batch rows, full (lane-dense) width.
                pl.BlockSpec((tb_rows, lx), lambda i: (i, 0)),
                # Weights: constant index_map -> DMA'd once, VMEM-resident.
                pl.BlockSpec((lx, lh0), lambda i: (0, 0)),
                pl.BlockSpec((lh0, lh1), lambda i: (0, 0)),
            ],
            out_specs=pl.BlockSpec((tb_rows, lh1), lambda i: (i, 0)),
        ),
        compiler_params=pltpu.CompilerParams(
            # Independent batch tiles: lets v7x shard the grid across its two
            # TensorCores; harmless on single-TC v5e/v6e.
            dimension_semantics=("parallel",),
        ),
        cost_estimate=pl.CostEstimate(
            flops=2 * rows * (lx * lh0 + lh0 * lh1),
            transcendentals=0,
            bytes_accessed=4 * (rows * (lx + lh1) + lx * lh0 + lh0 * lh1),
        ),
    )(xp, w0b, w1b)

    out = out.reshape(Bp, H1)         # free: row-major contiguous
    if Bp != B:
        out = out[:B]
    return out


def _init_linear_weight(key, in_features, out_features):
    # Deterministic init mimicking nn.Linear default (kaiming-uniform, bias=False),
    # stored transposed as (in, out) for the kernel.
    bound = 1.0 / jnp.sqrt(jnp.float32(in_features))
    return jax.random.uniform(
        key, (in_features, out_features), dtype=jnp.float32,
        minval=-bound, maxval=bound)


def _reference_forward(x, w0, w1):
    h = jnp.maximum(x @ w0, 0.0)
    return jnp.maximum(h @ w1, 0.0)


if __name__ == "__main__":
    # Small shapes consistent with the module defaults:
    #   n_features=16, hidden_neurons=[64, 32], batch=8
    batch, n_features = 8, 16
    hidden_neurons = [64, 32]

    key = jax.random.PRNGKey(0)
    k_x, k_w0, k_w1 = jax.random.split(key, 3)

    x = jax.random.normal(k_x, (batch, n_features), dtype=jnp.float32)
    w0 = _init_linear_weight(k_w0, n_features, hidden_neurons[0])          # input_layer
    w1 = _init_linear_weight(k_w1, hidden_neurons[0], hidden_neurons[1])   # net_output

    out = jax.block_until_ready(deep_svdd_forward(x, w0, w1))
    ref = _reference_forward(x, w0, w1)
    assert out.shape == (batch, hidden_neurons[1])
    assert jnp.allclose(out, ref, atol=2e-5, rtol=1e-4)

    # Ragged, multi-tile path (grid > 1, B not a tile multiple).
    x2 = jax.random.normal(jax.random.fold_in(k_x, 1), (200, n_features), dtype=jnp.float32)
    out2 = jax.block_until_ready(deep_svdd_forward(x2, w0, w1, block_batch=64))
    ref2 = _reference_forward(x2, w0, w1)
    assert out2.shape == (200, hidden_neurons[1])
    assert jnp.allclose(out2, ref2, atol=2e-5, rtol=1e-4)

    # Mid-size path exercising the forced >=2-tile (dual-TensorCore) split.
    x3 = jax.random.normal(jax.random.fold_in(k_x, 2), (5000, n_features), dtype=jnp.float32)
    out3 = jax.block_until_ready(deep_svdd_forward(x3, w0, w1))
    ref3 = _reference_forward(x3, w0, w1)
    assert out3.shape == (5000, hidden_neurons[1])
    assert jnp.allclose(out3, ref3, atol=2e-5, rtol=1e-4)

    print("KERNEL_OK")
</pallas_src>

<mosaic_0001>
module attributes {stable_mosaic.version = 11 : i64} {
  func.func @_deep_svdd_kernel(%arg0: i32, %arg1: memref<8x128xf32, #tpu.memory_space<vmem>>, %arg2: memref<128x512xf32, #tpu.memory_space<vmem>>, %arg3: memref<512x256xf32, #tpu.memory_space<vmem>>, %arg4: memref<8x256xf32, #tpu.memory_space<vmem>>) attributes {dimension_semantics = [#tpu.dimension_semantics<parallel>], iteration_bounds = array<i64: 1>, scalar_prefetch = 0 : i64, scratch_operands = 0 : i64, tpu.core_type = #tpu.core_type<tc>, window_params = [{transform_indices = @transform_0, window_bounds = array<i64: 8, 128>}, {pipeline_mode = #tpu.pipeline_mode<synchronous>, transform_indices = @transform_1, window_bounds = array<i64: 128, 512>}, {pipeline_mode = #tpu.pipeline_mode<synchronous>, transform_indices = @transform_2, window_bounds = array<i64: 512, 256>}, {transform_indices = @transform_3, window_bounds = array<i64: 8, 256>}]} {
    %c0 = arith.constant 0 : index
    %c0_0 = arith.constant 0 : index
    %0 = vector.load %arg1[%c0, %c0_0] : memref<8x128xf32, #tpu.memory_space<vmem>>, vector<8x128xf32>
    %c0_1 = arith.constant 0 : index
    %c0_2 = arith.constant 0 : index
    %1 = vector.load %arg2[%c0_1, %c0_2] : memref<128x512xf32, #tpu.memory_space<vmem>>, vector<128x512xf32>
    %cst = arith.constant dense<0.000000e+00> : vector<8x512xf32>
    %2 = tpu.matmul %0, %1, %cst {dimension_numbers = #tpu.dot_dimension_numbers<[1], [0], [0], [1], [0, 0, 1, 1], [], []>} : vector<8x128xf32>, vector<128x512xf32>, vector<8x512xf32> -> vector<8x512xf32>
    %cst_3 = arith.constant 0.000000e+00 : f32
    %3 = vector.broadcast %cst_3 : f32 to vector<8x512xf32>
    %4 = arith.maximumf %2, %3 : vector<8x512xf32>
    %c0_4 = arith.constant 0 : index
    %c0_5 = arith.constant 0 : index
    %5 = vector.load %arg3[%c0_4, %c0_5] : memref<512x256xf32, #tpu.memory_space<vmem>>, vector<512x256xf32>
    %cst_6 = arith.constant dense<0.000000e+00> : vector<8x256xf32>
    %6 = tpu.matmul %4, %5, %cst_6 {dimension_numbers = #tpu.dot_dimension_numbers<[1], [0], [0], [1], [0, 0, 1, 1], [], []>} : vector<8x512xf32>, vector<512x256xf32>, vector<8x256xf32> -> vector<8x256xf32>
    %cst_7 = arith.constant 0.000000e+00 : f32
    %7 = vector.broadcast %cst_7 : f32 to vector<8x256xf32>
    %8 = arith.maximumf %6, %7 : vector<8x256xf32>
    %c0_8 = arith.constant 0 : index
    %c0_9 = arith.constant 0 : index
    %9 = vector.load %arg4[%c0_8, %c0_9] : memref<8x256xf32, #tpu.memory_space<vmem>>, vector<8x256xf32>
    tpu.vector_store %arg4[%c0_8, %c0_9], %8 {strides = array<i32>} : memref<8x256xf32, #tpu.memory_space<vmem>>, vector<8x256xf32>,
    return
  }
  func.func @transform_0(%arg0: i32) -> (i32, i32) {
    %c0_i32 = arith.constant 0 : i32
    %c0_i32_0 = arith.constant 0 : i32
    return %arg0, %c0_i32 : i32, i32
  }
  func.func @transform_1(%arg0: i32) -> (i32, i32) {
    %c0_i32 = arith.constant 0 : i32
    %c0_i32_0 = arith.constant 0 : i32
    %c0_i32_1 = arith.constant 0 : i32
    return %c0_i32, %c0_i32_0 : i32, i32
  }
  func.func @transform_2(%arg0: i32) -> (i32, i32) {
    %c0_i32 = arith.constant 0 : i32
    %c0_i32_0 = arith.constant 0 : i32
    %c0_i32_1 = arith.constant 0 : i32
    return %c0_i32, %c0_i32_0 : i32, i32
  }
  func.func @transform_3(%arg0: i32) -> (i32, i32) {
    %c0_i32 = arith.constant 0 : i32
    %c0_i32_0 = arith.constant 0 : i32
    return %arg0, %c0_i32 : i32, i32
  }
}

</mosaic_0001>

<bundles_post_ra>
// kernel: tpu_custom_call.1
= control target key start
LH: loop header
LB: loop body
LE: loop exit
PB: predicated region body
PF: predicated region fallthrough
CT: control target
= control target key end

     0   :  { %8 = vsyncpa [#allocation3], 0  ;;  %s669_s0 = inlined_call_operand.hbm [shape: f32[8,128], index: 0, kind: input, shape index: {}]   ;;  %s670_s1 = inlined_call_operand.hbm [shape: f32[128,512], index: 1, kind: input, shape index: {}]   ;;  %s671_s2 = inlined_call_operand.hbm [shape: f32[512,256], index: 2, kind: input, shape index: {}]   ;;  %s672_s3 = inlined_call_operand.hbm [shape: f32[8,256], index: 3, kind: output, shape index: {}]  }
   0x1   :  { %9 = vsyncpa [#allocation6], 0  ;;  %s26_s14 = sshll.u32 %s670_s1, 4  ;;  %s27_s14 = int_to_ptr.hbm [resolvable:$true] %s26_s14 }
   0x2   :  { %10 = vsyncpa [#allocation4], 0  ;;  %s629_s15 = smov [#allocation5]   ;;  %s16_s19 = sshll.u32 %s669_s0, 4  ;;  %s17_s19 = int_to_ptr.hbm [resolvable:$true] %s16_s19 }
   0x3   :  { %s28_s16 = sshll.u32 %s629_s15, 4  ;;  %s630_s20 = smov 512   ;;  %s29_s16 = int_to_ptr.vmem [resolvable:$true] %s28_s16 }
   0x4   :  { %s631_s21 = smov 32   ;;  %s632_s22 = smov [#allocation2]  }
   0x5   :  { %34 = dma.hbm_to_vmem [thread:$0]  %s27_s14, 8192, %s29_s16, [#allocation6], %s630_s20, %s630_s20, %s631_s21  }
   0x6   :  { %s18_s23 = sshll.u32 %s632_s22, 4  ;;  %s39_s26 = sshll.u32 %s671_s2, 4  ;;  %s19_s23 = int_to_ptr.vmem [resolvable:$true] %s18_s23  ;;  %s40_s26 = int_to_ptr.hbm [resolvable:$true] %s39_s26 }
   0x7   :  { %21 = dma.hbm_to_vmem [thread:$0]  %s17_s19, 128, %s19_s23, [#allocation3]  }
   0x8   :  { %s633_s1 = smov [#allocation7]   ;;  %s634_s28 = smov 256  }
   0x9   :  { %s41_s27 = sshll.u32 %s633_s1, 4  ;;  %s635_s29 = smov 16   ;;  %s42_s27 = int_to_ptr.vmem [resolvable:$true] %s41_s27 }
   0xa   :  { %47 = dma.hbm_to_vmem [thread:$0]  %s40_s26, 16384, %s42_s27, [#allocation6], %s634_s28, %s634_s28, %s635_s29  }
   0xb   :  { %623 = dma.done.wait [#allocation3], 128  }
   0xc   :  { %624 = vsyncadd [#allocation3], 4294967168 }
   0xd   :  { %625 = dma.done.wait [#allocation6], 24576  }
   0xe   :  { %626 = vsyncadd [#allocation6], 4294942720  ;;  %v123_v0 = vld [vmem:[#allocation5 + $0x1f0] sm:$0xff]  ;;  %v124_v1 = vld [vmem:[#allocation5 + $0x1f8] sm:$0xff]  ;;  %s636_s0 = smov [#allocation8]   ;;  %s508_s5 = sshll.u32 %s672_s3, 4  ;;  %s509_s5 = int_to_ptr.hbm [resolvable:$true] %s508_s5 }
   0xf   :  { %v121_v2 = vld [vmem:[#allocation5 + $0x1e0] sm:$0xff]  ;;  %165 = vmatpush.msra.mxu2 %v123_v0  ;;  %185 = vmatpush.msra.mxu3 %v124_v1  ;;  %v122_v3 = vld [vmem:[#allocation5 + $0x1e8] sm:$0xff]  ;;  %v119_v4 = vld [vmem:[#allocation5 + $0x1d0] sm:$0xff]  ;;  %s506_s2 = sshll.u32 %s636_s0, 4  ;;  %s507_s2 = int_to_ptr.vmem [resolvable:$true] %s506_s2 }
  0x10   :  { %v120_v5 = vld [vmem:[#allocation5 + $0x1d8] sm:$0xff]  ;;  %125 = vmatpush.msra.mxu0 %v121_v2  ;;  %145 = vmatpush.msra.mxu1 %v122_v3  ;;  %v117_v6 = vld [vmem:[#allocation5 + $0x1c0] sm:$0xff]  ;;  %v118_v7 = vld [vmem:[#allocation5 + $0x1c8] sm:$0xff] }
  0x11   :  { %v115_v8 = vld [vmem:[#allocation5 + $0x1b0] sm:$0xff]  ;;  %166 = vmatpush.msra.mxu2 %v119_v4  ;;  %186 = vmatpush.msra.mxu3 %v120_v5  ;;  %v116_v9 = vld [vmem:[#allocation5 + $0x1b8] sm:$0xff]  ;;  %v113_v10 = vld [vmem:[#allocation5 + $0x1a0] sm:$0xff] }
  0x12   :  { %v114_v11 = vld [vmem:[#allocation5 + $0x1a8] sm:$0xff]  ;;  %126 = vmatpush.msra.mxu0 %v117_v6  ;;  %146 = vmatpush.msra.mxu1 %v118_v7  ;;  %v111_v12 = vld [vmem:[#allocation5 + $0x190] sm:$0xff]  ;;  %v112_v13 = vld [vmem:[#allocation5 + $0x198] sm:$0xff] }
  0x13   :  { %167 = vmatpush.msra.mxu2 %v115_v8  ;;  %187 = vmatpush.msra.mxu3 %v116_v9  ;;  %v109_v14 = vld [vmem:[#allocation5 + $0x180] sm:$0xff]  ;;  %v110_v15 = vld [vmem:[#allocation5 + $0x188] sm:$0xff]  ;;  %v107_v16 = vld [vmem:[#allocation5 + $0x170] sm:$0xff] }
  0x14   :  { %127 = vmatpush.msra.mxu0 %v113_v10  ;;  %147 = vmatpush.msra.mxu1 %v114_v11  ;;  %v108_v17 = vld [vmem:[#allocation5 + $0x178] sm:$0xff]  ;;  %v105_v18 = vld [vmem:[#allocation5 + $0x160] sm:$0xff]  ;;  %v106_v19 = vld [vmem:[#allocation5 + $0x168] sm:$0xff] }
  0x15   :  { %168 = vmatpush.msra.mxu2 %v111_v12  ;;  %188 = vmatpush.msra.mxu3 %v112_v13  ;;  %v103_v20 = vld [vmem:[#allocation5 + $0x150] sm:$0xff]  ;;  %v104_v21 = vld [vmem:[#allocation5 + $0x158] sm:$0xff]  ;;  %v101_v22 = vld [vmem:[#allocation5 + $0x140] sm:$0xff] }
  0x16   :  { %128 = vmatpush.msra.mxu0 %v109_v14  ;;  %148 = vmatpush.msra.mxu1 %v110_v15  ;;  %v102_v23 = vld [vmem:[#allocation5 + $0x148] sm:$0xff]  ;;  %v99_v24 = vld [vmem:[#allocation5 + $0x130] sm:$0xff]  ;;  %v100_v25 = vld [vmem:[#allocation5 + $0x138] sm:$0xff] }
  0x17   :  { %169 = vmatpush.msra.mxu2 %v107_v16  ;;  %189 = vmatpush.msra.mxu3 %v108_v17  ;;  %v97_v26 = vld [vmem:[#allocation5 + $0x120] sm:$0xff]  ;;  %v98_v27 = vld [vmem:[#allocation5 + $0x128] sm:$0xff]  ;;  %v95_v28 = vld [vmem:[#allocation5 + $0x110] sm:$0xff] }
  0x18   :  { %129 = vmatpush.msra.mxu0 %v105_v18  ;;  %149 = vmatpush.msra.mxu1 %v106_v19  ;;  %v96_v29 = vld [vmem:[#allocation5 + $0x118] sm:$0xff]  ;;  %v93_v30 = vld [vmem:[#allocation5 + $0x100] sm:$0xff]  ;;  %v94_v31 = vld [vmem:[#allocation5 + $0x108] sm:$0xff] }
  0x19   :  { %170 = vmatpush.msra.mxu2 %v103_v20  ;;  %190 = vmatpush.msra.mxu3 %v104_v21  ;;  %v91_v32 = vld [vmem:[#allocation5 + $0xf0] sm:$0xff]  ;;  %v92_v33 = vld [vmem:[#allocation5 + $0xf8] sm:$0xff]  ;;  %v89_v34 = vld [vmem:[#allocation5 + $0xe0] sm:$0xff] }
  0x1a   :  { %130 = vmatpush.msra.mxu0 %v101_v22  ;;  %150 = vmatpush.msra.mxu1 %v102_v23  ;;  %v90_v35 = vld [vmem:[#allocation5 + $0xe8] sm:$0xff]  ;;  %v87_v36 = vld [vmem:[#allocation5 + $0xd0] sm:$0xff]  ;;  %v88_v37 = vld [vmem:[#allocation5 + $0xd8] sm:$0xff] }
  0x1b   :  { %171 = vmatpush.msra.mxu2 %v99_v24  ;;  %191 = vmatpush.msra.mxu3 %v100_v25  ;;  %v85_v38 = vld [vmem:[#allocation5 + $0xc0] sm:$0xff]  ;;  %v86_v39 = vld [vmem:[#allocation5 + $0xc8] sm:$0xff]  ;;  %v83_v40 = vld [vmem:[#allocation5 + $0xb0] sm:$0xff] }
  0x1c   :  { %131 = vmatpush.msra.mxu0 %v97_v26  ;;  %151 = vmatpush.msra.mxu1 %v98_v27  ;;  %v84_v41 = vld [vmem:[#allocation5 + $0xb8] sm:$0xff]  ;;  %v81_v42 = vld [vmem:[#allocation5 + $0xa0] sm:$0xff]  ;;  %v82_v43 = vld [vmem:[#allocation5 + $0xa8] sm:$0xff] }
  0x1d   :  { %172 = vmatpush.msra.mxu2 %v95_v28  ;;  %192 = vmatpush.msra.mxu3 %v96_v29  ;;  %v79_v44 = vld [vmem:[#allocation5 + $0x90] sm:$0xff]  ;;  %v80_v45 = vld [vmem:[#allocation5 + $0x98] sm:$0xff]  ;;  %v77_v46 = vld [vmem:[#allocation5 + $0x80] sm:$0xff] }
  0x1e   :  { %132 = vmatpush.msra.mxu0 %v93_v30  ;;  %152 = vmatpush.msra.mxu1 %v94_v31  ;;  %v78_v47 = vld [vmem:[#allocation5 + $0x88] sm:$0xff]  ;;  %v75_v48 = vld [vmem:[#allocation5 + $0x70] sm:$0xff]  ;;  %v76_v49 = vld [vmem:[#allocation5 + $0x78] sm:$0xff] }
  0x1f   :  { %173 = vmatpush.msra.mxu2 %v91_v32  ;;  %193 = vmatpush.msra.mxu3 %v92_v33  ;;  %v73_v50 = vld [vmem:[#allocation5 + $0x60] sm:$0xff]  ;;  %v74_v51 = vld [vmem:[#allocation5 + $0x68] sm:$0xff]  ;;  %v71_v52 = vld [vmem:[#allocation5 + $0x50] sm:$0xff] }
  0x20   :  { %133 = vmatpush.msra.mxu0 %v89_v34  ;;  %153 = vmatpush.msra.mxu1 %v90_v35  ;;  %v72_v53 = vld [vmem:[#allocation5 + $0x58] sm:$0xff]  ;;  %v69_v54 = vld [vmem:[#allocation5 + $0x40] sm:$0xff]  ;;  %v70_v55 = vld [vmem:[#allocation5 + $0x48] sm:$0xff] }
  0x21   :  { %174 = vmatpush.msra.mxu2 %v87_v36  ;;  %194 = vmatpush.msra.mxu3 %v88_v37  ;;  %v67_v56 = vld [vmem:[#allocation5 + $0x30] sm:$0xff]  ;;  %v68_v57 = vld [vmem:[#allocation5 + $0x38] sm:$0xff]  ;;  %v65_v58 = vld [vmem:[#allocation5 + $0x20] sm:$0xff] }
  0x22   :  { %134 = vmatpush.msra.mxu0 %v85_v38  ;;  %154 = vmatpush.msra.mxu1 %v86_v39  ;;  %v66_v59 = vld [vmem:[#allocation5 + $0x28] sm:$0xff]  ;;  %v63_v60 = vld [vmem:[#allocation5 + $0x10] sm:$0xff]  ;;  %v64_v61 = vld [vmem:[#allocation5 + $0x18] sm:$0xff] }
  0x23   :  { %175 = vmatpush.msra.mxu2 %v83_v40  ;;  %195 = vmatpush.msra.mxu3 %v84_v41  ;;  %v60_v62 = vld [vmem:[#allocation2] sm:$0xff]  ;;  %v61_v63 = vld [vmem:[#allocation5] sm:$0xff]  ;;  %v62_v0 = vld [vmem:[#allocation5 + $0x8] sm:$0xff] }
  0x24   :  { %135 = vmatpush.msra.mxu0 %v81_v42  ;;  %155 = vmatpush.msra.mxu1 %v82_v43  ;;  %v239_v1 = vld [vmem:[#allocation7 + $0xf0] sm:$0xff]  ;;  %v237_v5 = vld [vmem:[#allocation7 + $0xe0] sm:$0xff] }
  0x25   :  { %176 = vmatpush.msra.mxu2 %v79_v44  ;;  %196 = vmatpush.msra.mxu3 %v80_v45  ;;  %v271_v2 = vld [vmem:[#allocation7 + $0x1f0] sm:$0xff]  ;;  %v269_v6 = vld [vmem:[#allocation7 + $0x1e0] sm:$0xff] }
  0x26   :  { %136 = vmatpush.msra.mxu0 %v77_v46  ;;  %156 = vmatpush.msra.mxu1 %v78_v47  ;;  %v303_v3 = vld [vmem:[#allocation7 + $0x2f0] sm:$0xff]  ;;  %v301_v7 = vld [vmem:[#allocation7 + $0x2e0] sm:$0xff] }
  0x27   :  { %177 = vmatpush.msra.mxu2 %v75_v48  ;;  %197 = vmatpush.msra.mxu3 %v76_v49  ;;  %v335_v4 = vld [vmem:[#allocation7 + $0x3f0] sm:$0xff]  ;;  %v333_v8 = vld [vmem:[#allocation7 + $0x3e0] sm:$0xff] }
  0x28   :  { %137 = vmatpush.msra.mxu0 %v73_v50  ;;  %157 = vmatpush.msra.mxu1 %v74_v51  ;;  %v235_v9 = vld [vmem:[#allocation7 + $0xd0] sm:$0xff]  ;;  %v233_v13 = vld [vmem:[#allocation7 + $0xc0] sm:$0xff] }
  0x29   :  { %178 = vmatpush.msra.mxu2 %v71_v52  ;;  %198 = vmatpush.msra.mxu3 %v72_v53  ;;  %v267_v10 = vld [vmem:[#allocation7 + $0x1d0] sm:$0xff]  ;;  %v265_v14 = vld [vmem:[#allocation7 + $0x1c0] sm:$0xff] }
  0x2a   :  { %138 = vmatpush.msra.mxu0 %v69_v54  ;;  %158 = vmatpush.msra.mxu1 %v70_v55  ;;  %v299_v11 = vld [vmem:[#allocation7 + $0x2d0] sm:$0xff]  ;;  %v297_v15 = vld [vmem:[#allocation7 + $0x2c0] sm:$0xff] }
  0x2b   :  { %179 = vmatpush.msra.mxu2 %v67_v56  ;;  %199 = vmatpush.msra.mxu3 %v68_v57  ;;  %v331_v12 = vld [vmem:[#allocation7 + $0x3d0] sm:$0xff]  ;;  %v329_v16 = vld [vmem:[#allocation7 + $0x3c0] sm:$0xff] }
  0x2c   :  { %139 = vmatpush.msra.mxu0 %v65_v58  ;;  %159 = vmatpush.msra.mxu1 %v66_v59  ;;  %v231_v17 = vld [vmem:[#allocation7 + $0xb0] sm:$0xff]  ;;  %v229_v21 = vld [vmem:[#allocation7 + $0xa0] sm:$0xff] }
  0x2d   :  { %180 = vmatpush.msra.mxu2 %v63_v60  ;;  %200 = vmatpush.msra.mxu3 %v64_v61  ;;  %v263_v18 = vld [vmem:[#allocation7 + $0x1b0] sm:$0xff]  ;;  %v261_v22 = vld [vmem:[#allocation7 + $0x1a0] sm:$0xff] }
  0x2e   :  { %181 = vmatmul.f32.vlgmr.msra.gmra.mxu2 %v60_v62  ;;  %201 = vmatmul.f32.vlgmr.msra.gmra.mxu3 %v60_v62  ;;  %v295_v19 = vld [vmem:[#allocation7 + $0x2b0] sm:$0xff]  ;;  %v293_v23 = vld [vmem:[#allocation7 + $0x2a0] sm:$0xff] }
  0x2f   :  { %140 = vmatpush.msra.mxu0 %v61_v63  ;;  %160 = vmatpush.msra.mxu1 %v62_v0  ;;  %v327_v20 = vld [vmem:[#allocation7 + $0x3b0] sm:$0xff]  ;;  %v325_v24 = vld [vmem:[#allocation7 + $0x3a0] sm:$0xff]  ;;  %v240_v63 = vld [vmem:[#allocation7 + $0xf8] sm:$0xff] }
  0x30   :  { %141 = vmatmul.f32.vlgmr.msra.gmra.mxu0 %v60_v62  ;;  %161 = vmatmul.f32.vlgmr.msra.gmra.mxu1 %v60_v62  ;;  %v227_v25 = vld [vmem:[#allocation7 + $0x90] sm:$0xff]  ;;  %v225_v29 = vld [vmem:[#allocation7 + $0x80] sm:$0xff]  ;;  %v272_v0 = vld [vmem:[#allocation7 + $0x1f8] sm:$0xff] }
  0x31   :  { %337 = vmatpush.msrb.mxu0 %v239_v1  ;;  %357 = vmatpush.msrb.mxu1 %v271_v2  ;;  %v259_v26 = vld [vmem:[#allocation7 + $0x190] sm:$0xff]  ;;  %v257_v30 = vld [vmem:[#allocation7 + $0x180] sm:$0xff] }
  0x32   :  { %377 = vmatpush.msrb.mxu2 %v303_v3  ;;  %397 = vmatpush.msrb.mxu3 %v335_v4  ;;  %v291_v27 = vld [vmem:[#allocation7 + $0x290] sm:$0xff]  ;;  %v289_v31 = vld [vmem:[#allocation7 + $0x280] sm:$0xff]  ;;  %v238_v3 = vld [vmem:[#allocation7 + $0xe8] sm:$0xff] }
  0x33   :  { %338 = vmatpush.msrb.mxu0 %v237_v5  ;;  %358 = vmatpush.msrb.mxu1 %v269_v6  ;;  %v323_v28 = vld [vmem:[#allocation7 + $0x390] sm:$0xff]  ;;  %v321_v32 = vld [vmem:[#allocation7 + $0x380] sm:$0xff]  ;;  %v270_v4 = vld [vmem:[#allocation7 + $0x1e8] sm:$0xff] }
  0x34   :  { %378 = vmatpush.msrb.mxu2 %v301_v7  ;;  %398 = vmatpush.msrb.mxu3 %v333_v8  ;;  %v223_v33 = vld [vmem:[#allocation7 + $0x70] sm:$0xff]  ;;  %v221_v37 = vld [vmem:[#allocation7 + $0x60] sm:$0xff]  ;;  %v304_v5 = vld [vmem:[#allocation7 + $0x2f8] sm:$0xff] }
  0x35   :  { %339 = vmatpush.msrb.mxu0 %v235_v9  ;;  %359 = vmatpush.msrb.mxu1 %v267_v10  ;;  %v255_v34 = vld [vmem:[#allocation7 + $0x170] sm:$0xff]  ;;  %v253_v38 = vld [vmem:[#allocation7 + $0x160] sm:$0xff]  ;;  %v336_v6 = vld [vmem:[#allocation7 + $0x3f8] sm:$0xff] }
  0x36   :  { %379 = vmatpush.msrb.mxu2 %v299_v11  ;;  %399 = vmatpush.msrb.mxu3 %v331_v12  ;;  %v287_v35 = vld [vmem:[#allocation7 + $0x270] sm:$0xff]  ;;  %v285_v39 = vld [vmem:[#allocation7 + $0x260] sm:$0xff]  ;;  %v236_v7 = vld [vmem:[#allocation7 + $0xd8] sm:$0xff] }
  0x37   :  { %340 = vmatpush.msrb.mxu0 %v233_v13  ;;  %360 = vmatpush.msrb.mxu1 %v265_v14  ;;  %v319_v36 = vld [vmem:[#allocation7 + $0x370] sm:$0xff]  ;;  %v317_v40 = vld [vmem:[#allocation7 + $0x360] sm:$0xff]  ;;  %v268_v8 = vld [vmem:[#allocation7 + $0x1d8] sm:$0xff] }
  0x38   :  { %380 = vmatpush.msrb.mxu2 %v297_v15  ;;  %400 = vmatpush.msrb.mxu3 %v329_v16  ;;  %v219_v41 = vld [vmem:[#allocation7 + $0x50] sm:$0xff]  ;;  %v217_v45 = vld [vmem:[#allocation7 + $0x40] sm:$0xff]  ;;  %v302_v9 = vld [vmem:[#allocation7 + $0x2e8] sm:$0xff] }
  0x39   :  { %341 = vmatpush.msrb.mxu0 %v231_v17  ;;  %361 = vmatpush.msrb.mxu1 %v263_v18  ;;  %v251_v42 = vld [vmem:[#allocation7 + $0x150] sm:$0xff]  ;;  %v249_v46 = vld [vmem:[#allocation7 + $0x140] sm:$0xff]  ;;  %v334_v10 = vld [vmem:[#allocation7 + $0x3e8] sm:$0xff] }
  0x3a   :  { %381 = vmatpush.msrb.mxu2 %v295_v19  ;;  %401 = vmatpush.msrb.mxu3 %v327_v20  ;;  %v283_v43 = vld [vmem:[#allocation7 + $0x250] sm:$0xff]  ;;  %v281_v47 = vld [vmem:[#allocation7 + $0x240] sm:$0xff]  ;;  %v234_v11 = vld [vmem:[#allocation7 + $0xc8] sm:$0xff] }
  0x3b   :  { %342 = vmatpush.msrb.mxu0 %v229_v21  ;;  %362 = vmatpush.msrb.mxu1 %v261_v22  ;;  %v315_v44 = vld [vmem:[#allocation7 + $0x350] sm:$0xff]  ;;  %v313_v48 = vld [vmem:[#allocation7 + $0x340] sm:$0xff]  ;;  %v266_v12 = vld [vmem:[#allocation7 + $0x1c8] sm:$0xff] }
  0x3c   :  { %382 = vmatpush.msrb.mxu2 %v293_v23  ;;  %402 = vmatpush.msrb.mxu3 %v325_v24  ;;  %v215_v49 = vld [vmem:[#allocation7 + $0x30] sm:$0xff]  ;;  %v213_v53 = vld [vmem:[#allocation7 + $0x20] sm:$0xff]  ;;  %v300_v13 = vld [vmem:[#allocation7 + $0x2d8] sm:$0xff] }
  0x3d   :  { %343 = vmatpush.msrb.mxu0 %v227_v25  ;;  %363 = vmatpush.msrb.mxu1 %v259_v26  ;;  %v247_v50 = vld [vmem:[#allocation7 + $0x130] sm:$0xff]  ;;  %v245_v54 = vld [vmem:[#allocation7 + $0x120] sm:$0xff]  ;;  %v332_v14 = vld [vmem:[#allocation7 + $0x3d8] sm:$0xff] }
  0x3e   :  { %383 = vmatpush.msrb.mxu2 %v291_v27  ;;  %403 = vmatpush.msrb.mxu3 %v323_v28  ;;  %v279_v51 = vld [vmem:[#allocation7 + $0x230] sm:$0xff]  ;;  %v277_v55 = vld [vmem:[#allocation7 + $0x220] sm:$0xff]  ;;  %v232_v15 = vld [vmem:[#allocation7 + $0xb8] sm:$0xff] }
  0x3f   :  { %344 = vmatpush.msrb.mxu0 %v225_v29  ;;  %364 = vmatpush.msrb.mxu1 %v257_v30  ;;  %v311_v52 = vld [vmem:[#allocation7 + $0x330] sm:$0xff]  ;;  %v309_v56 = vld [vmem:[#allocation7 + $0x320] sm:$0xff]  ;;  %v264_v16 = vld [vmem:[#allocation7 + $0x1b8] sm:$0xff] }
  0x40   :  { %384 = vmatpush.msrb.mxu2 %v289_v31  ;;  %404 = vmatpush.msrb.mxu3 %v321_v32  ;;  %v211_v57 = vld [vmem:[#allocation7 + $0x10] sm:$0xff]  ;;  %v209_v61 = vld [vmem:[#allocation7] sm:$0xff]  ;;  %v298_v17 = vld [vmem:[#allocation7 + $0x2c8] sm:$0xff] }
  0x41   :  { %345 = vmatpush.msrb.mxu0 %v223_v33  ;;  %365 = vmatpush.msrb.mxu1 %v255_v34  ;;  %v243_v58 = vld [vmem:[#allocation7 + $0x110] sm:$0xff]  ;;  %v241_v62 = vld [vmem:[#allocation7 + $0x100] sm:$0xff]  ;;  %v330_v18 = vld [vmem:[#allocation7 + $0x3c8] sm:$0xff] }
  0x42   :  { %385 = vmatpush.msrb.mxu2 %v287_v35  ;;  %405 = vmatpush.msrb.mxu3 %v319_v36  ;;  %v275_v59 = vld [vmem:[#allocation7 + $0x210] sm:$0xff]  ;;  %v273_v1 = vld [vmem:[#allocation7 + $0x200] sm:$0xff]  ;;  %v230_v19 = vld [vmem:[#allocation7 + $0xa8] sm:$0xff] }
  0x43   :  { %346 = vmatpush.msrb.mxu0 %v221_v37  ;;  %366 = vmatpush.msrb.mxu1 %v253_v38  ;;  %v307_v60 = vld [vmem:[#allocation7 + $0x310] sm:$0xff]  ;;  %v305_v2 = vld [vmem:[#allocation7 + $0x300] sm:$0xff]  ;;  %v262_v20 = vld [vmem:[#allocation7 + $0x1a8] sm:$0xff] }
  0x44   :  { %386 = vmatpush.msrb.mxu2 %v285_v39  ;;  %406 = vmatpush.msrb.mxu3 %v317_v40  ;;  %v296_v21 = vld [vmem:[#allocation7 + $0x2b8] sm:$0xff]  ;;  %v294_v25 = vld [vmem:[#allocation7 + $0x2a8] sm:$0xff] }
  0x45   :  { %347 = vmatpush.msrb.mxu0 %v219_v41  ;;  %367 = vmatpush.msrb.mxu1 %v251_v42  ;;  %v328_v22 = vld [vmem:[#allocation7 + $0x3b8] sm:$0xff]  ;;  %v326_v26 = vld [vmem:[#allocation7 + $0x3a8] sm:$0xff] }
  0x46   :  { %387 = vmatpush.msrb.mxu2 %v283_v43  ;;  %407 = vmatpush.msrb.mxu3 %v315_v44  ;;  %v228_v23 = vld [vmem:[#allocation7 + $0x98] sm:$0xff]  ;;  %v226_v27 = vld [vmem:[#allocation7 + $0x88] sm:$0xff] }
  0x47   :  { %348 = vmatpush.msrb.mxu0 %v217_v45  ;;  %368 = vmatpush.msrb.mxu1 %v249_v46  ;;  %v260_v24 = vld [vmem:[#allocation7 + $0x198] sm:$0xff]  ;;  %v258_v28 = vld [vmem:[#allocation7 + $0x188] sm:$0xff] }
  0x48   :  { %388 = vmatpush.msrb.mxu2 %v281_v47  ;;  %408 = vmatpush.msrb.mxu3 %v313_v48  ;;  %v292_v29 = vld [vmem:[#allocation7 + $0x298] sm:$0xff]  ;;  %v290_v33 = vld [vmem:[#allocation7 + $0x288] sm:$0xff] }
  0x49   :  { %349 = vmatpush.msrb.mxu0 %v215_v49  ;;  %369 = vmatpush.msrb.mxu1 %v247_v50  ;;  %v324_v30 = vld [vmem:[#allocation7 + $0x398] sm:$0xff]  ;;  %v322_v34 = vld [vmem:[#allocation7 + $0x388] sm:$0xff] }
  0x4a   :  { %389 = vmatpush.msrb.mxu2 %v279_v51  ;;  %409 = vmatpush.msrb.mxu3 %v311_v52  ;;  %v224_v31 = vld [vmem:[#allocation7 + $0x78] sm:$0xff]  ;;  %v222_v35 = vld [vmem:[#allocation7 + $0x68] sm:$0xff] }
  0x4b   :  { %350 = vmatpush.msrb.mxu0 %v213_v53  ;;  %370 = vmatpush.msrb.mxu1 %v245_v54  ;;  %v256_v32 = vld [vmem:[#allocation7 + $0x178] sm:$0xff]  ;;  %v254_v36 = vld [vmem:[#allocation7 + $0x168] sm:$0xff] }
  0x4c   :  { %390 = vmatpush.msrb.mxu2 %v277_v55  ;;  %410 = vmatpush.msrb.mxu3 %v309_v56  ;;  %v220_v37 = vld [vmem:[#allocation7 + $0x58] sm:$0xff]  ;;  %v218_v41 = vld [vmem:[#allocation7 + $0x48] sm:$0xff] }
  0x4d   :  { %351 = vmatpush.msrb.mxu0 %v211_v57  ;;  %371 = vmatpush.msrb.mxu1 %v243_v58  ;;  %v252_v38 = vld [vmem:[#allocation7 + $0x158] sm:$0xff]  ;;  %v250_v42 = vld [vmem:[#allocation7 + $0x148] sm:$0xff] }
  0x4e   :  { %391 = vmatpush.msrb.mxu2 %v275_v59  ;;  %411 = vmatpush.msrb.mxu3 %v307_v60  ;;  %v288_v39 = vld [vmem:[#allocation7 + $0x278] sm:$0xff]  ;;  %v286_v43 = vld [vmem:[#allocation7 + $0x268] sm:$0xff] }
  0x4f   :  { %352 = vmatpush.msrb.mxu0 %v209_v61  ;;  %372 = vmatpush.msrb.mxu1 %v241_v62  ;;  %v320_v40 = vld [vmem:[#allocation7 + $0x378] sm:$0xff]  ;;  %v318_v44 = vld [vmem:[#allocation7 + $0x368] sm:$0xff] }
  0x50   :  { %392 = vmatpush.msrb.mxu2 %v273_v1  ;;  %412 = vmatpush.msrb.mxu3 %v305_v2  ;;  %v216_v45 = vld [vmem:[#allocation7 + $0x38] sm:$0xff]  ;;  %v214_v49 = vld [vmem:[#allocation7 + $0x28] sm:$0xff] }
  0x51   :  { %417 = vmatpush.msra.mxu0 %v240_v63  ;;  %437 = vmatpush.msra.mxu1 %v272_v0  ;;  %v248_v46 = vld [vmem:[#allocation7 + $0x138] sm:$0xff]  ;;  %v246_v50 = vld [vmem:[#allocation7 + $0x128] sm:$0xff] }
  0x52   :  { %457 = vmatpush.msra.mxu2 %v304_v5  ;;  %477 = vmatpush.msra.mxu3 %v336_v6  ;;  %v284_v47 = vld [vmem:[#allocation7 + $0x258] sm:$0xff]  ;;  %v282_v51 = vld [vmem:[#allocation7 + $0x248] sm:$0xff] }
  0x53   :  { %418 = vmatpush.msra.mxu0 %v238_v3  ;;  %438 = vmatpush.msra.mxu1 %v270_v4  ;;  %v316_v48 = vld [vmem:[#allocation7 + $0x358] sm:$0xff]  ;;  %v314_v52 = vld [vmem:[#allocation7 + $0x348] sm:$0xff] }
  0x54   :  { %458 = vmatpush.msra.mxu2 %v302_v9  ;;  %478 = vmatpush.msra.mxu3 %v334_v10  ;;  %v212_v53 = vld [vmem:[#allocation7 + $0x18] sm:$0xff]  ;;  %v210_v57 = vld [vmem:[#allocation7 + $0x8] sm:$0xff] }
  0x55   :  { %419 = vmatpush.msra.mxu0 %v236_v7  ;;  %439 = vmatpush.msra.mxu1 %v268_v8  ;;  %v244_v54 = vld [vmem:[#allocation7 + $0x118] sm:$0xff]  ;;  %v242_v58 = vld [vmem:[#allocation7 + $0x108] sm:$0xff] }
  0x56   :  { %459 = vmatpush.msra.mxu2 %v300_v13  ;;  %479 = vmatpush.msra.mxu3 %v332_v14  ;;  %v280_v55 = vld [vmem:[#allocation7 + $0x238] sm:$0xff]  ;;  %v278_v59 = vld [vmem:[#allocation7 + $0x228] sm:$0xff] }
  0x57   :  { %420 = vmatpush.msra.mxu0 %v234_v11  ;;  %440 = vmatpush.msra.mxu1 %v266_v12  ;;  %v312_v56 = vld [vmem:[#allocation7 + $0x338] sm:$0xff]  ;;  %v310_v60 = vld [vmem:[#allocation7 + $0x328] sm:$0xff] }
  0x58   :  { %460 = vmatpush.msra.mxu2 %v298_v17  ;;  %480 = vmatpush.msra.mxu3 %v330_v18  ;;  %v276_v61 = vld [vmem:[#allocation7 + $0x218] sm:$0xff]  ;;  %v274_v63 = vld [vmem:[#allocation7 + $0x208] sm:$0xff] }
  0x59   :  { %421 = vmatpush.msra.mxu0 %v232_v15  ;;  %441 = vmatpush.msra.mxu1 %v264_v16  ;;  %v308_v62 = vld [vmem:[#allocation7 + $0x318] sm:$0xff]  ;;  %v306_v0 = vld [vmem:[#allocation7 + $0x308] sm:$0xff] }
  0x5a   :  { %461 = vmatpush.msra.mxu2 %v296_v21  ;;  %481 = vmatpush.msra.mxu3 %v328_v22 }
  0x5b   :  { %422 = vmatpush.msra.mxu0 %v230_v19  ;;  %442 = vmatpush.msra.mxu1 %v262_v20 }
  0x5c   :  { %462 = vmatpush.msra.mxu2 %v294_v25  ;;  %482 = vmatpush.msra.mxu3 %v326_v26 }
  0x5d   :  { %423 = vmatpush.msra.mxu0 %v228_v23  ;;  %443 = vmatpush.msra.mxu1 %v260_v24 }
  0x5e   :  { %463 = vmatpush.msra.mxu2 %v292_v29  ;;  %483 = vmatpush.msra.mxu3 %v324_v30 }
  0x5f   :  { %424 = vmatpush.msra.mxu0 %v226_v27  ;;  %444 = vmatpush.msra.mxu1 %v258_v28 }
  0x60   :  { %464 = vmatpush.msra.mxu2 %v290_v33  ;;  %484 = vmatpush.msra.mxu3 %v322_v34 }
  0x61   :  { %425 = vmatpush.msra.mxu0 %v224_v31  ;;  %445 = vmatpush.msra.mxu1 %v256_v32 }
  0x62   :  { %465 = vmatpush.msra.mxu2 %v288_v39  ;;  %485 = vmatpush.msra.mxu3 %v320_v40 }
  0x63   :  { %426 = vmatpush.msra.mxu0 %v222_v35  ;;  %446 = vmatpush.msra.mxu1 %v254_v36 }
  0x64   :  { %466 = vmatpush.msra.mxu2 %v286_v43  ;;  %486 = vmatpush.msra.mxu3 %v318_v44 }
  0x65   :  { %427 = vmatpush.msra.mxu0 %v220_v37  ;;  %447 = vmatpush.msra.mxu1 %v252_v38 }
  0x66   :  { %467 = vmatpush.msra.mxu2 %v284_v47  ;;  %487 = vmatpush.msra.mxu3 %v316_v48 }
  0x67   :  { %428 = vmatpush.msra.mxu0 %v218_v41  ;;  %448 = vmatpush.msra.mxu1 %v250_v42 }
  0x68   :  { %468 = vmatpush.msra.mxu2 %v282_v51  ;;  %488 = vmatpush.msra.mxu3 %v314_v52 }
  0x69   :  { %429 = vmatpush.msra.mxu0 %v216_v45  ;;  %449 = vmatpush.msra.mxu1 %v248_v46 }
  0x6a   :  { %469 = vmatpush.msra.mxu2 %v280_v55  ;;  %489 = vmatpush.msra.mxu3 %v312_v56 }
  0x6b   :  { %430 = vmatpush.msra.mxu0 %v214_v49  ;;  %450 = vmatpush.msra.mxu1 %v246_v50 }
  0x6c   :  { %470 = vmatpush.msra.mxu2 %v278_v59  ;;  %490 = vmatpush.msra.mxu3 %v310_v60 }
  0x6d   :  { %431 = vmatpush.msra.mxu0 %v212_v53  ;;  %451 = vmatpush.msra.mxu1 %v244_v54 }
  0x6e   :  { %471 = vmatpush.msra.mxu2 %v276_v61  ;;  %491 = vmatpush.msra.mxu3 %v308_v62 }
  0x6f   :  { %432 = vmatpush.msra.mxu0 %v210_v57  ;;  %452 = vmatpush.msra.mxu1 %v242_v58 }
  0x70   :  { %472 = vmatpush.msra.mxu2 %v274_v63  ;;  %492 = vmatpush.msra.mxu3 %v306_v0 }
  0xad   :  { %v142_v1 = vpop.f32.mrf.mxu0  ;;  %v162_v2 = vpop.f32.mrf.mxu1 }
  0xae   :  { %v205_v3 = vmax.f32 %v142_v1, 0.0  ;;  %v206_v4 = vmax.f32 %v162_v2, 0.0 }
  0xb0   :  { %353 = vmatmul.f32.vlgmr.msrb.gmra.mxu0 %v205_v3  ;;  %373 = vmatmul.f32.vlgmr.msrb.gmra.mxu1 %v206_v4 }
  0xb1   :  { %v182_v5 = vpop.f32.mrf.mxu2  ;;  %v202_v6 = vpop.f32.mrf.mxu3 }
  0xb2   :  { %v207_v7 = vmax.f32 %v182_v5, 0.0  ;;  %v208_v8 = vmax.f32 %v202_v6, 0.0 }
  0xb4   :  { %393 = vmatmul.f32.vlgmr.msrb.gmra.mxu2 %v207_v7  ;;  %413 = vmatmul.f32.vlgmr.msrb.gmra.mxu3 %v208_v8 }
  0xb8   :  { %433 = vmatmul.f32.vlgmr.msra.gmra.mxu0 %v205_v3  ;;  %453 = vmatmul.f32.vlgmr.msra.gmra.mxu1 %v206_v4 }
  0xbc   :  { %473 = vmatmul.f32.vlgmr.msra.gmra.mxu2 %v207_v7  ;;  %493 = vmatmul.f32.vlgmr.msra.gmra.mxu3 %v208_v8 }
 0x12d   :  { %v354_v9 = vpop.f32.mrf.mxu0  ;;  %v374_v10 = vpop.f32.mrf.mxu1 }
 0x12e   :  { %v375_v11 = vadd.f32 %v374_v10, %v354_v9 }
 0x135   :  { %v434_v16 = vpop.f32.mrf.mxu0  ;;  %v454_v17 = vpop.f32.mrf.mxu1 }
 0x136   :  { %v455_v19 = vadd.f32 %v454_v17, %v434_v16 }
 0x137   :  { %v394_v12 = vpop.f32.mrf.mxu2  ;;  %v414_v13 = vpop.f32.mrf.mxu3 }
 0x138   :  { %v395_v14 = vadd.f32 %v394_v12, %v375_v11 }
 0x13a   :  { %v415_v15 = vadd.f32 %v414_v13, %v395_v14 }
 0x13c   :  { %v497_v18 = vmax.f32 %v415_v15, 0.0 }
 0x13e   :  { %499 = vst [vmem:[#allocation8] sm:$0xff] %v497_v18 }
 0x13f   :  { %v474_v20 = vpop.f32.mrf.mxu2  ;;  %v494_v22 = vpop.f32.mrf.mxu3 }
 0x140   :  { %v475_v21 = vadd.f32 %v474_v20, %v455_v19 }
 0x142   :  { %v495_v23 = vadd.f32 %v494_v22, %v475_v21 }
 0x144   :  { %v498_v24 = vmax.f32 %v495_v23, 0.0 }
 0x146   :  { %500 = vst [vmem:[#allocation8 + $0x8] sm:$0xff] %v498_v24 }
 0x147   :  { %511 = dma.vmem_to_hbm [thread:$0]  %s507_s2, 256, %s509_s5, [#allocation4]  }
 0x148   :  { %627 = dma.done.wait [#allocation4], 256  }
 0x149   :  { %628 = vsyncadd [#allocation4], 4294967040 }
 0x14a   :  { %516 = vsyncpa [#allocation3], 1 }
 0x14b   :  { %517 = vsyncpa [#allocation6], 1 }
 0x14c   :  { %518 = vsyncpa [#allocation4], 1 }

</bundles_post_ra>
